<compile_context>
chip_gen: v6e
topology: v6e:2x2x1
jax: 0.10.0
libtpu: 0.0.40
codegen_flags: <defaults>
</compile_context>

<pallas_src>
import jax
import jax.numpy as jnp
import numpy as np
from jax.experimental import pallas as pl
from jax.experimental.pallas import tpu as pltpu


def _affine_kernel(x_ref, scale_ref, shift_ref, o_ref):
    # x_ref / o_ref: (TR, TL) tile in VMEM.
    # scale_ref / shift_ref: (TR, 1) per-row f32 affine params, broadcast over lanes.
    x = x_ref[...].astype(jnp.float32)
    y = x * scale_ref[...] + shift_ref[...]
    o_ref[...] = y.astype(o_ref.dtype)


def _per_generation_defaults():
    """(target_block_bytes, vmem_limit_bytes) tuned per TPU generation."""
    try:
        kind = jax.devices()[0].device_kind.lower()
    except Exception:  # pragma: no cover - defensive only
        kind = ""
    if "v7" in kind or "7x" in kind:
        # 3.2 TB/s HBM: bigger blocks to hide the per-step grid overhead,
        # explicit vmem limit under the 64 MiB physical VMEM per TC.
        return 6 * 1024 * 1024, 48 << 20
    if "v6" in kind or "6e" in kind:
        # 4 buffers x 4 MiB = 16 MiB, fits the 32 MiB default scoped VMEM.
        return 4 * 1024 * 1024, None
    # v5e (or unknown): 2 MiB blocks stay well inside the 16 MiB default.
    return 2 * 1024 * 1024, None


def _choose_tiles(R, L, itemsize, sub, target_bytes):
    """Pick a (TR, TL) block: lane-dense, ~target_bytes, dtype-native sublanes."""
    # Lane (last-dim) tile: multiple of 128 when possible, else the full L
    # (equal-to-full-dim also satisfies the tiling rule).
    if L % 128 == 0:
        max_tl = max(128, (target_bytes // (sub * itemsize)) // 128 * 128)
        TL = min(L, max_tl)
    else:
        TL = L
    # Sublane (row) tile: multiple of the native packed sublane count, or full R.
    tr = max(1, target_bytes // (TL * itemsize))
    if tr >= R:
        TR = R
    else:
        TR = min(R, max(sub, (tr // sub) * sub))

    # Prefer >= 4 grid steps (v7x megacore sharding + pipelining), without
    # dropping blocks below native-tile granularity.
    def _steps():
        return pl.cdiv(R, TR) * pl.cdiv(L, TL)

    while _steps() < 4 and TR >= 2 * sub:
        TR = max(sub, (TR // 2) // sub * sub)
    while _steps() < 4 and TL >= 256 and TL % 256 == 0:
        TL //= 2
    return TR, TL


def inverse_transform(x, old_mean, old_std, new_mean, new_std,
                      target_block_bytes=None):
    """Pallas implementation of InverseTransform.forward (NCHW input)."""
    N, C, H, W = x.shape
    out_dtype = x.dtype if jnp.issubdtype(x.dtype, jnp.floating) else jnp.float32

    default_blk, vmem_limit = _per_generation_defaults()
    if target_block_bytes is None:
        target_block_bytes = default_blk

    old_mean = jnp.asarray(old_mean, jnp.float32)
    old_std = jnp.asarray(old_std, jnp.float32)
    new_mean = jnp.asarray(new_mean, jnp.float32)
    new_std = jnp.asarray(new_std, jnp.float32)

    scale = old_std / new_std                      # (C,)
    shift = (old_mean - new_mean) / new_std        # (C,)

    R, L = N * C, H * W
    # Per-row f32 params for the flattened (N*C, H*W) view: row r = n*C + c.
    scale_rows = jnp.tile(scale, N).reshape(R, 1)
    shift_rows = jnp.tile(shift, N).reshape(R, 1)

    xf = x.reshape(R, L)                           # contiguous reshape, free

    in_item = jnp.dtype(x.dtype).itemsize
    out_item = jnp.dtype(out_dtype).itemsize
    size_item = max(in_item, out_item)             # conservative VMEM sizing
    sub = max(8, 32 // min(in_item, out_item))     # native packed sublane count

    TR, TL = _choose_tiles(R, L, size_item, sub, target_block_bytes)
    grid = (pl.cdiv(R, TR), pl.cdiv(L, TL))        # rows outermost: scale/shift
                                                   # blocks reused across inner j

    cost = pl.CostEstimate(
        flops=2 * R * L,
        transcendentals=0,
        bytes_accessed=R * L * in_item + R * L * out_item + 2 * R * 4,
    )

    out = pl.pallas_call(
        _affine_kernel,
        out_shape=jax.ShapeDtypeStruct((R, L), out_dtype),
        grid=grid,
        in_specs=[
            pl.BlockSpec((TR, TL), lambda i, j: (i, j)),   # x tile
            pl.BlockSpec((TR, 1), lambda i, j: (i, 0)),    # per-row scale (f32)
            pl.BlockSpec((TR, 1), lambda i, j: (i, 0)),    # per-row shift (f32)
        ],
        out_specs=pl.BlockSpec((TR, TL), lambda i, j: (i, j)),
        compiler_params=pltpu.CompilerParams(
            dimension_semantics=("parallel", "parallel"),
            vmem_limit_bytes=vmem_limit,
        ),
        cost_estimate=cost,
    )(xf, scale_rows, shift_rows)

    return out.reshape(N, C, H, W)


def _reference(x, old_mean, old_std, new_mean, new_std):
    om = jnp.asarray(old_mean, jnp.float32)[None, :, None, None]
    os = jnp.asarray(old_std, jnp.float32)[None, :, None, None]
    nm = jnp.asarray(new_mean, jnp.float32)[None, :, None, None]
    ns = jnp.asarray(new_std, jnp.float32)[None, :, None, None]
    return ((x.astype(jnp.float32) * os + om) - nm) / ns


if __name__ == "__main__":
    # Deterministic "parameters" (module __init__ takes old_mean / old_std;
    # new_transforms chosen as Normalize(new_mean, new_std)).
    old_mean = [0.485, 0.456, 0.406]
    old_std = [0.229, 0.224, 0.225]
    new_mean = [0.5, 0.5, 0.5]
    new_std = [0.5, 0.5, 0.5]

    key = jax.random.PRNGKey(0)
    k1, k2, k3, k4 = jax.random.split(key, 4)

    # 1) Primary small f32 check (NCHW, 3 channels like the PyTorch module).
    x1 = jax.random.normal(k1, (2, 3, 16, 16), dtype=jnp.float32)
    out1 = jax.block_until_ready(
        inverse_transform(x1, old_mean, old_std, new_mean, new_std))
    ref1 = _reference(x1, old_mean, old_std, new_mean, new_std)
    np.testing.assert_allclose(np.asarray(out1), np.asarray(ref1),
                               rtol=1e-5, atol=1e-5)

    # 2) bf16 input: math runs in f32 inside the kernel, cast on store.
    x2 = jax.random.normal(k2, (2, 3, 16, 128), dtype=jnp.bfloat16)
    out2 = jax.block_until_ready(
        inverse_transform(x2, old_mean, old_std, new_mean, new_std))
    assert out2.dtype == jnp.bfloat16
    ref2 = _reference(x2, old_mean, old_std, new_mean, new_std)
    np.testing.assert_allclose(np.asarray(out2, dtype=np.float32),
                               np.asarray(ref2), rtol=2e-2, atol=2e-2)

    # 3) Integer (uint8) input promoted to float32 output.
    x3 = jax.random.randint(k3, (2, 3, 16, 16), 0, 256, dtype=jnp.int32)
    x3 = x3.astype(jnp.uint8)
    out3 = jax.block_until_ready(
        inverse_transform(x3, old_mean, old_std, new_mean, new_std))
    assert out3.dtype == jnp.float32
    ref3 = _reference(x3, old_mean, old_std, new_mean, new_std)
    np.testing.assert_allclose(np.asarray(out3), np.asarray(ref3),
                               rtol=1e-5, atol=1e-4)

    # 4) Tiny target block size forces a multi-block grid with a partial
    #    (masked) last row-block, exercising the tiling/masking path.
    x4 = jax.random.normal(k4, (5, 3, 16, 16), dtype=jnp.float32)
    out4 = jax.block_until_ready(
        inverse_transform(x4, old_mean, old_std, new_mean, new_std,
                          target_block_bytes=8 * 1024))
    ref4 = _reference(x4, old_mean, old_std, new_mean, new_std)
    np.testing.assert_allclose(np.asarray(out4), np.asarray(ref4),
                               rtol=1e-5, atol=1e-5)

    print("KERNEL_OK")
</pallas_src>

<mosaic_0001>
module attributes {stable_mosaic.version = 11 : i64} {
  func.func @_affine_kernel(%arg0: i32, %arg1: i32, %arg2: memref<6x128xf32, #tpu.memory_space<vmem>>, %arg3: memref<6x1xf32, #tpu.memory_space<vmem>>, %arg4: memref<6x1xf32, #tpu.memory_space<vmem>>, %arg5: memref<6x128xf32, #tpu.memory_space<vmem>>) attributes {dimension_semantics = [#tpu.dimension_semantics<parallel>, #tpu.dimension_semantics<parallel>], iteration_bounds = array<i64: 1, 2>, scalar_prefetch = 0 : i64, scratch_operands = 0 : i64, tpu.core_type = #tpu.core_type<tc>, window_params = [{transform_indices = @transform_0, window_bounds = array<i64: 6, 128>}, {transform_indices = @transform_1, window_bounds = array<i64: 6, 1>}, {transform_indices = @transform_2, window_bounds = array<i64: 6, 1>}, {transform_indices = @transform_3, window_bounds = array<i64: 6, 128>}]} {
    %c0 = arith.constant 0 : index
    %c0_0 = arith.constant 0 : index
    %0 = vector.load %arg2[%c0, %c0_0] : memref<6x128xf32, #tpu.memory_space<vmem>>, vector<6x128xf32>
    %c0_1 = arith.constant 0 : index
    %c0_2 = arith.constant 0 : index
    %1 = vector.load %arg3[%c0_1, %c0_2] : memref<6x1xf32, #tpu.memory_space<vmem>>, vector<6x1xf32>
    %2 = vector.broadcast %1 : vector<6x1xf32> to vector<6x128xf32>
    %3 = arith.mulf %0, %2 : vector<6x128xf32>
    %c0_3 = arith.constant 0 : index
    %c0_4 = arith.constant 0 : index
    %4 = vector.load %arg4[%c0_3, %c0_4] : memref<6x1xf32, #tpu.memory_space<vmem>>, vector<6x1xf32>
    %5 = vector.broadcast %4 : vector<6x1xf32> to vector<6x128xf32>
    %6 = arith.addf %3, %5 : vector<6x128xf32>
    %c0_5 = arith.constant 0 : index
    %c0_6 = arith.constant 0 : index
    %7 = vector.load %arg5[%c0_5, %c0_6] : memref<6x128xf32, #tpu.memory_space<vmem>>, vector<6x128xf32>
    tpu.vector_store %arg5[%c0_5, %c0_6], %6 {strides = array<i32>} : memref<6x128xf32, #tpu.memory_space<vmem>>, vector<6x128xf32>,
    return
  }
  func.func @transform_0(%arg0: i32, %arg1: i32) -> (i32, i32) {
    %c0_i32 = arith.constant 0 : i32
    return %arg0, %arg1 : i32, i32
  }
  func.func @transform_1(%arg0: i32, %arg1: i32) -> (i32, i32) {
    %c0_i32 = arith.constant 0 : i32
    %c0_i32_0 = arith.constant 0 : i32
    return %arg0, %c0_i32 : i32, i32
  }
  func.func @transform_2(%arg0: i32, %arg1: i32) -> (i32, i32) {
    %c0_i32 = arith.constant 0 : i32
    %c0_i32_0 = arith.constant 0 : i32
    return %arg0, %c0_i32 : i32, i32
  }
  func.func @transform_3(%arg0: i32, %arg1: i32) -> (i32, i32) {
    %c0_i32 = arith.constant 0 : i32
    return %arg0, %arg1 : i32, i32
  }
}

</mosaic_0001>

<bundles_post_ra>
// kernel: tpu_custom_call.1
= control target key start
LH: loop header
LB: loop body
LE: loop exit
PB: predicated region body
PF: predicated region fallthrough
CT: control target
= control target key end

     0   :  { %8 = vsyncpa [#allocation3], 0  ;;  %s640_s0 = inlined_call_operand.vmem [shape: f32[6,256], index: 0, kind: input, shape index: {}]   ;;  %s641_s1 = inlined_call_operand.vmem [shape: f32[6,1], index: 1, kind: input, shape index: {}]   ;;  %s642_s2 = inlined_call_operand.vmem [shape: f32[6,1], index: 2, kind: input, shape index: {}]   ;;  %s643_s3 = inlined_call_operand.hbm [shape: f32[6,256], index: 3, kind: output, shape index: {}]  }
   0x1   :  { %10 = vsyncpa [#allocation3 + $0x1], 0  ;;  %s535_s12 = smov 0   ;;  %s537_s13 = smov 0  }
   0x2   :  { %s539_s14 = smov 0   ;;  %s541_s15 = smov 0  }
   0x3   :  { %s543_s16 = smov 0   ;;  %s545_s17 = smov 0  }
   0x4 LB: > { %s365_s18 = sadd.s32 4294967295, %s511_s17   ;;  %s366_s19 = sadd.s32 4294967294, %s511_s17   ;;  %s511_s17 = sphi %s545_s17, %s16_s17   ;;  %s507_s16 = sphi %s543_s16, %s650_s16   ;;  %s503_s15 = sphi %s541_s15, %s649_s15   ;;  %s499_s14 = sphi %s539_s14, %s648_s14   ;;  %s495_s13 = sphi %s537_s13, %s647_s13   ;;  %s491_s12 = sphi %s535_s12, %s646_s12  }
   0x5   : > { %s25_s20 = sadd.s32 1, %s507_s16  ;;  %s117_s21 = sadd.s32 1, %s499_s14 }
   0x6   : > { %p26_p0 = scmp.ge.s32.totalorder %s25_s20, 2  ;;  %p127_p1 = scmp.ne.s32.totalorder %s499_s14, %s495_s13 }
   0x7   : > { %p128_p2 = scmp.eq.s32.totalorder %s365_s18, 1  ;;  %p133_p3 = scmp.ne.s32.totalorder %s495_s13, %s491_s12 }
   0x8   : > { %s652_s20 = smov (%p26_p0, %s25_s20), 0  ;;  %p134_p5 = scmp.eq.s32.totalorder %s366_s19, 1 }
   0x9   : > { %p575_p4 = por %p128_p2, %p127_p1  ;;  %s113_s23 = ssub.s32 %s507_s16, %s652_s20 }
   0xa   : > { %p371_p6 = scmp.ge.s32.totalorder %s511_s17, 1  ;;  %p115_p7 = scmp.eq.s32.totalorder %s113_s23, 0 }
   0xb   : > { %p582_p8 = por %p134_p5, %p133_p3  ;;  %p177_p9 = scmp.lt.s32.totalorder %s511_s17, 3 }
   0xc   : > { %s588_s25 = scalar_select %p115_p7, %s499_s14, %s117_s21  }
   0xd   : > { %p178_p10 = pnand %p371_p6, %p177_p9 }
   0xe   : > { %p214_p11 = scmp.lt.s32.totalorder (!%p178_p10), %s503_s15, 1  ;;  %s209_s4 = sand.u32 (!%p178_p10), 1, %s495_s13  }
   0xf   : > { %181 = sbr.rel (%p178_p10) target bundleno = 165 (0xa5), region = 32  ;;  %s372_s6 = sshll.u32 (!%p178_p10), %s209_s4, 3 }
  0x10   : > { %s375_s10 = sshll.u32 (!%p178_p10), %s503_s15, 7  ;;  %s211_s11 = scalar_lea.vmem (!%p178_p10), [#allocation2], %s372_s6 }
  0x11   : > { %s260_s18 = sshll.u32 (!%p178_p10), %s211_s11, 4  ;;  %s258_s23 = scalar_lea.hbm (!%p178_p10), %s643_s3, %s375_s10  ;;  %s261_s18 = int_to_ptr.vmem [resolvable:$true] %s260_s18 }
  0x12   : > { %s245_s26 = scalar_lea.sflag (!%p178_p10), [#allocation3], %s209_s4  ;;  %s435_s27 = scalar_lea.vmem (!%p178_p10), %s261_s18, 128 }
  0x13   : > { %p436_p12 = scmp.ne.s32.totalorder (!%p178_p10), %s261_s18, %s435_s27  ;;  %s514_s28 = smov (!%p178_p10), [#allocation2]  }
  0x14   : > { %v229_v0 = vld [vmem:[%s641_s1] sm:$0x3f]  ;;  %v513_v1 = vmov 0   ;;  %s215_s30 = scalar_select %p214_p11, %s503_s15, 1 }
  0x15   : > { %434 = vset.pattern.permute.xlu0 %v513_v1  ;;  %v236_v2 = vld [vmem:[%s642_s2] sm:$0x3f]  ;;  %p437_p13 = pnand %p436_p12, %p575_p4  ;;  %s439_s29 = sshll.u32 %s514_s28, 4  ;;  %s440_s29 = int_to_ptr.vmem [resolvable:$false] %s439_s29 }
  0x16   : > { %232 = vperm.xlu0 %434, %v229_v0   ;;  %s373_s5 = sshll.u32 %s215_s30, 3  ;;  %s441_s15 = scalar_lea.vmem %s440_s29, 256 }
  0x17   : > { %s219_s9 = scalar_lea.vmem %s640_s0, %s373_s5  ;;  %p438_p0 = pneg %p437_p13 }
  0x18   : > { %v228_v4 = vld [vmem:[%s219_s9] sm:$0x3f]  ;;  %p442_p1 = scmp.lt.s32.totalorder %s261_s18, %s440_s29  ;;  %p443_p2 = scmp.lt.s32.totalorder %s441_s15, %s435_s27 }
  0x1a   : > { %239 = vperm.xlu0 %434, %v236_v2   ;;  %p444_p3 = por %p443_p2, %p442_p1 }
  0x1c   : > { %p445_p5 = pnand %p444_p3, %p438_p0 }
  0x91   : > { %v233_v3 = vpop.permute.xlu0 %232 }
  0x92   : > { %v235_v5 = vmul.f32 %v233_v3, %v228_v4 }
  0x95   : > { %v240_v6 = vpop.permute.xlu0 %239 }
  0x96   : > { %v242_v7 = vadd.f32 %v240_v6, %v235_v5 }
  0x98   : > { %243 = vst [vmem:[%s211_s11] sm:$0x3f] %v242_v7 }
  0x99   : > { %448 = shalt.err (!%p445_p5)
}
  0x9a   : > { %s449_s30 = scalar_lea.hbm %s258_s23, 128  ;;  %s453_s6 = scalar_lea.hbm %s643_s3, 256 }
  0x9b   : > { %p450_p6 = scmp.ne.s32.totalorder %s258_s23, %s449_s30  ;;  %p454_p10 = scmp.lt.s32.totalorder %s258_s23, %s643_s3 }
  0x9c   : > { %p455_p11 = scmp.lt.s32.totalorder %s453_s6, %s449_s30 }
  0x9d   : > { %p451_p7 = pnand %p450_p6, %p575_p4 }
  0x9e   : > { %p456_p12 = por %p455_p11, %p454_p10 }
  0x9f   : > { %p452_p9 = pneg %p451_p7 }
  0xa1   : > { %p457_p13 = pnand %p456_p12, %p452_p9 }
  0xa3   : > { %460 = shalt.err (!%p457_p13)
}
  0xa4   : > { %378 = dma.vmem_to_hbm [thread:$0]  (%p575_p4), %s261_s18, 128, %s258_s23, %s245_s26  }
  0xa5 PF: > { %p384_p0 = scmp.ge.s32.totalorder %s511_s17, 2  ;;  %s272_s9 = sand.u32 1, %s491_s12  }
  0xa6   : > { %s273_s10 = scalar_lea.sflag [#allocation3], %s272_s9 }
  0xa7   : > { %p381_p1 = pnand %p384_p0, %p582_p8 }
  0xa9   : > { %p382_p2 = pneg %p381_p1 }
  0xab   : > { %486 = dma.done.wait (%p382_p2), %s273_s10, 128  }
  0xac   : > { %488 = vsyncadd (%p382_p2), %s273_s10, 4294967168  ;;  %s16_s17 = sadd.s32 1, %s511_s17   ;;  %s646_s12 = smov %s495_s13 }
  0xad   : > { %p13_p3 = scmp.ge.s32.totalorder %s16_s17, 4   ;;  %s647_s13 = smov %s499_s14 }
  0xae   : > { %s648_s14 = smov %s588_s25  ;;  %s649_s15 = smov %s507_s16 }
  0xaf   : > { %s650_s16 = smov %s652_s20  ;;  %15 = sbr.rel (!%p13_p3) target bundleno = 4 (0x4), region = 73 }
  0xb4   :  { %278 = vsyncpa [#allocation3], 1 }
  0xb5   :  { %280 = vsyncpa [#allocation3 + $0x1], 1 }

</bundles_post_ra>
